<compile_context>
chip_gen: v5e
topology: v5e:2x2
jax: 0.10.0
libtpu: 0.0.40
codegen_flags: <defaults>
</compile_context>

<pallas_src>
import functools

import jax
import jax.numpy as jnp
from jax.experimental import pallas as pl
from jax.experimental.pallas import tpu as pltpu


def convblock_kernel(x_ref, lm_ref, lp_ref, r1_ref, g1_ref, b1_ref,
                     r2_ref, g2_ref, b2_ref, s_ref, st_ref, q_ref, t_ref, p_ref,
                     o_ref, *, N, H, W):
    inv_count = jnp.float32(1.0 / (N * H * W))
    eps = jnp.float32(1e-5)

    lm = lm_ref[...]      # (NH, NH)   exact row shift  r -> r-1 (zero at image top)
    lp = lp_ref[...]      # (NH, NH)   exact row shift  r -> r+1 (zero at image bottom)
    s = s_ref[...]        # (W*Cout, Cout)  per-channel reduce over the w lane-blocks
    st = st_ref[...]      # (Cout, W*Cout)  per-channel broadcast back to lanes

    def conv3x3(src, r_ref):
        # src: (NH, W*Ci) f32 lane-packed.  r_ref[kh]: banded bf16 (W*Ci, W*Cout)
        # slab holding the kw-shift + 3x3 weights.  Returns (NH, W*Cout) f32.
        taps = (jnp.dot(lm, src, preferred_element_type=jnp.float32),
                src,
                jnp.dot(lp, src, preferred_element_type=jnp.float32))
        acc = jnp.dot(taps[0].astype(jnp.bfloat16), r_ref[0],
                      preferred_element_type=jnp.float32)
        acc += jnp.dot(taps[1].astype(jnp.bfloat16), r_ref[1],
                       preferred_element_type=jnp.float32)
        acc += jnp.dot(taps[2].astype(jnp.bfloat16), r_ref[2],
                       preferred_element_type=jnp.float32)
        return acc

    def bn_relu(acc, g_ref, b_ref):
        # Training-mode BatchNorm with batch statistics; two-pass (mean-centered)
        # variance for numerical robustness, then fused affine + ReLU.
        mean_c = jnp.sum(jnp.dot(acc, s, preferred_element_type=jnp.float32),
                         axis=0, keepdims=True) * inv_count               # (1, Cout)
        mean_l = jnp.dot(mean_c, st, preferred_element_type=jnp.float32)  # (1, W*Cout)
        cen = acc - mean_l
        var_c = jnp.sum(jnp.dot(cen * cen, s, preferred_element_type=jnp.float32),
                        axis=0, keepdims=True) * inv_count
        scale_c = g_ref[...] * jax.lax.rsqrt(var_c + eps)
        scale_l = jnp.dot(scale_c, st, preferred_element_type=jnp.float32)
        beta_l = jnp.dot(b_ref[...], st, preferred_element_type=jnp.float32)
        return jnp.maximum(cen * scale_l + beta_l, jnp.float32(0.0))

    x = x_ref[...]                                        # (NH, W*Cin) f32
    y1 = bn_relu(conv3x3(x, r1_ref), g1_ref, b1_ref)      # (NH, W*Cout)
    y2 = bn_relu(conv3x3(y1, r2_ref), g2_ref, b2_ref)     # (NH, W*Cout)

    # 2x2 max pool, stride 2, entirely in registers:
    #   h pairs: shift rows down by one (lp), max, select even-h rows (q).
    #   w pairs: shift lanes by one channel block (t), max, select even-w blocks (p).
    mh = jnp.maximum(y2, jnp.dot(lp, y2, preferred_element_type=jnp.float32))
    ph = jnp.dot(q_ref[...], mh, preferred_element_type=jnp.float32)     # (NH/2, W*Cout)
    mw = jnp.maximum(ph, jnp.dot(ph, t_ref[...], preferred_element_type=jnp.float32))
    o_ref[...] = jnp.dot(mw, p_ref[...], preferred_element_type=jnp.float32)


def _structural_mats(N, H, W, C):
    f32 = jnp.float32
    eye_n = jnp.eye(N, dtype=f32)
    eye_c = jnp.eye(C, dtype=f32)
    lm = jnp.kron(eye_n, jnp.eye(H, k=-1, dtype=f32))        # tap row r -> r-1
    lp = jnp.kron(eye_n, jnp.eye(H, k=1, dtype=f32))         # tap row r -> r+1
    q = jnp.kron(eye_n, jnp.eye(H, dtype=f32)[::2, :])       # select even-h rows
    t = jnp.kron(jnp.eye(W, k=-1, dtype=f32), eye_c)         # lane shift w -> w+1
    p_sel = jnp.kron(jnp.eye(W, dtype=f32)[:, ::2], eye_c)   # select even-w blocks
    s = jnp.kron(jnp.ones((W, 1), f32), eye_c)               # (W*C, C) reduce over w
    st = jnp.transpose(s)                                    # (C, W*C) broadcast
    return lm, lp, q, t, p_sel, s, st


def _banded_weights(w_hwio, W):
    # (3, 3, Ci, Co) HWIO -> (3, W*Ci, W*Co): one slab per kh; the kw shifts and the
    # zero-padding in w are encoded as a block band (off-band entries are zero).
    Ci, Co = int(w_hwio.shape[2]), int(w_hwio.shape[3])
    slabs = []
    for kh in range(3):
        slab = jnp.zeros((W * Ci, W * Co), jnp.float32)
        for kw in range(3):
            shift_w = jnp.eye(W, k=-(kw - 1), dtype=jnp.float32)
            slab = slab + jnp.kron(shift_w, w_hwio[kh, kw].astype(jnp.float32))
        slabs.append(slab)
    return jnp.stack(slabs, axis=0).astype(jnp.bfloat16)


@jax.jit
def conv_block_forward(x_nchw, p):
    x = jnp.transpose(x_nchw, (0, 2, 3, 1)).astype(jnp.float32)   # NCHW -> NHWC
    N, H, W, Cin = x.shape
    Cout = p["w1"].shape[-1]

    x_pk = x.reshape(N * H, W * Cin)                               # lane-packed rows
    lm, lp, q, t, p_sel, s, st = _structural_mats(N, H, W, Cout)
    r1 = _banded_weights(p["w1"], W)                               # (3, W*Cin,  W*Cout) bf16
    r2 = _banded_weights(p["w2"], W)                               # (3, W*Cout, W*Cout) bf16
    g1 = p["g1"].astype(jnp.float32); b1 = p["b1"].astype(jnp.float32)
    g2 = p["g2"].astype(jnp.float32); b2 = p["b2"].astype(jnp.float32)
    # conv biases (p["cb1"], p["cb2"]) are exactly cancelled by the batch-stat BN
    # mean subtraction -> not passed into the kernel.

    NH, WCi, WCo = N * H, W * Cin, W * Cout
    flops = 2 * (2 * NH * NH * WCi + 3 * NH * WCi * WCo            # conv1
                 + 2 * NH * NH * WCo + 3 * NH * WCo * WCo          # conv2
                 + 2 * (2 * NH * WCo * Cout + 3 * Cout * WCo)      # 2x BN reduce/bcast
                 + NH * NH * WCo + (NH // 2) * NH * WCo            # pool (h)
                 + (NH // 2) * WCo * WCo + (NH // 2) * WCo * (WCo // 2))  # pool (w)

    args = (x_pk, lm, lp, r1, g1, b1, r2, g2, b2, s, st, q, t, p_sel)
    bytes_accessed = sum(int(a.size) * a.dtype.itemsize for a in args) \
        + (NH // 2) * (WCo // 2) * 4

    vmem = lambda: pl.BlockSpec(memory_space=pltpu.MemorySpace.VMEM)
    out = pl.pallas_call(
        functools.partial(convblock_kernel, N=N, H=H, W=W),
        out_shape=jax.ShapeDtypeStruct((N * (H // 2), (W // 2) * Cout), jnp.float32),
        in_specs=[vmem() for _ in args],
        out_specs=vmem(),
        cost_estimate=pl.CostEstimate(flops=flops, transcendentals=2 * Cout,
                                      bytes_accessed=bytes_accessed),
    )(*args)

    out = out.reshape(N, H // 2, W // 2, Cout)
    return jnp.transpose(out, (0, 3, 1, 2))                        # NHWC -> NCHW


# ---------------- pure-JAX references (PyTorch training-mode forward) ----------------
def _conv(x, w, b, operand_dtype):
    y = jax.lax.conv_general_dilated(
        x.astype(operand_dtype), w.astype(operand_dtype),
        window_strides=(1, 1), padding=((1, 1), (1, 1)),
        dimension_numbers=("NHWC", "HWIO", "NHWC"),
        preferred_element_type=jnp.float32)
    return y + b.reshape(1, 1, 1, -1).astype(jnp.float32)


def _bn_relu(y, g, b, eps=1e-5):
    mu = jnp.mean(y, axis=(0, 1, 2), keepdims=True)
    var = jnp.mean((y - mu) ** 2, axis=(0, 1, 2), keepdims=True)
    z = (y - mu) * jax.lax.rsqrt(var + eps) * g.reshape(1, 1, 1, -1) + b.reshape(1, 1, 1, -1)
    return jnp.maximum(z, 0.0)


def ref_forward(x_nchw, p, matmul_dtype=jnp.float32):
    x = jnp.transpose(x_nchw, (0, 2, 3, 1)).astype(jnp.float32)
    y = _bn_relu(_conv(x, p["w1"], p["cb1"], matmul_dtype), p["g1"], p["b1"])
    y = _bn_relu(_conv(y, p["w2"], p["cb2"], matmul_dtype), p["g2"], p["b2"])
    N, H, W, C = y.shape
    y = jnp.max(y.reshape(N, H // 2, 2, W // 2, 2, C), axis=(2, 4))
    return jnp.transpose(y, (0, 3, 1, 2))


if __name__ == "__main__":
    key = jax.random.PRNGKey(0)
    ks = jax.random.split(key, 9)
    N, Cin, Cout, H, W = 2, 4, 8, 16, 16

    x = jax.random.normal(ks[0], (N, Cin, H, W), jnp.float32)
    # Deterministic synthetic parameters (shapes from ConvBlock(Cin, Cout).__init__)
    p = {
        "w1": 0.2 * jax.random.normal(ks[1], (3, 3, Cin, Cout), jnp.float32),   # conv1 weight (HWIO)
        "cb1": 0.1 * jax.random.normal(ks[2], (1, Cout), jnp.float32),          # conv1 bias
        "g1": 1.0 + 0.1 * jax.random.normal(ks[3], (1, Cout), jnp.float32),     # BN1 gamma
        "b1": 0.1 * jax.random.normal(ks[4], (1, Cout), jnp.float32),           # BN1 beta
        "w2": 0.2 * jax.random.normal(ks[5], (3, 3, Cout, Cout), jnp.float32),  # conv2 weight (HWIO)
        "cb2": 0.1 * jax.random.normal(ks[6], (1, Cout), jnp.float32),          # conv2 bias
        "g2": 1.0 + 0.1 * jax.random.normal(ks[7], (1, Cout), jnp.float32),     # BN2 gamma
        "b2": 0.1 * jax.random.normal(ks[8], (1, Cout), jnp.float32),           # BN2 beta
    }

    out = jax.block_until_ready(conv_block_forward(x, p))
    assert out.shape == (N, Cout, H // 2, W // 2), out.shape

    # Implementation check at matched precision (bf16 conv operands, f32 accumulation).
    ref_mp = jax.block_until_ready(ref_forward(x, p, matmul_dtype=jnp.bfloat16))
    assert jnp.allclose(out, ref_mp, atol=1e-2, rtol=1e-2), float(jnp.max(jnp.abs(out - ref_mp)))

    # Semantic check against the pure-f32 PyTorch-equivalent forward (bf16 MXU rounding only).
    ref_f32 = jax.block_until_ready(ref_forward(x, p, matmul_dtype=jnp.float32))
    assert jnp.allclose(out, ref_f32, atol=3e-2, rtol=3e-2), float(jnp.max(jnp.abs(out - ref_f32)))

    print("KERNEL_OK")
</pallas_src>

<mosaic_0001>
module attributes {stable_mosaic.version = 11 : i64} {
  func.func @convblock_kernel(%arg0: memref<32x64xf32, #tpu.memory_space<vmem>>, %arg1: memref<32x32xf32, #tpu.memory_space<vmem>>, %arg2: memref<32x32xf32, #tpu.memory_space<vmem>>, %arg3: memref<3x64x128xbf16, #tpu.memory_space<vmem>>, %arg4: memref<1x8xf32, #tpu.memory_space<vmem>>, %arg5: memref<1x8xf32, #tpu.memory_space<vmem>>, %arg6: memref<3x128x128xbf16, #tpu.memory_space<vmem>>, %arg7: memref<1x8xf32, #tpu.memory_space<vmem>>, %arg8: memref<1x8xf32, #tpu.memory_space<vmem>>, %arg9: memref<128x8xf32, #tpu.memory_space<vmem>>, %arg10: memref<8x128xf32, #tpu.memory_space<vmem>>, %arg11: memref<16x32xf32, #tpu.memory_space<vmem>>, %arg12: memref<128x128xf32, #tpu.memory_space<vmem>>, %arg13: memref<128x64xf32, #tpu.memory_space<vmem>>, %arg14: memref<16x64xf32, #tpu.memory_space<vmem>>) attributes {dimension_semantics = [], scalar_prefetch = 0 : i64, scratch_operands = 0 : i64, tpu.core_type = #tpu.core_type<tc>} {
    %c0 = arith.constant 0 : index
    %c0_0 = arith.constant 0 : index
    %0 = vector.load %arg1[%c0, %c0_0] : memref<32x32xf32, #tpu.memory_space<vmem>>, vector<32x32xf32>
    %c0_1 = arith.constant 0 : index
    %c0_2 = arith.constant 0 : index
    %1 = vector.load %arg2[%c0_1, %c0_2] : memref<32x32xf32, #tpu.memory_space<vmem>>, vector<32x32xf32>
    %c0_3 = arith.constant 0 : index
    %c0_4 = arith.constant 0 : index
    %2 = vector.load %arg9[%c0_3, %c0_4] : memref<128x8xf32, #tpu.memory_space<vmem>>, vector<128x8xf32>
    %c0_5 = arith.constant 0 : index
    %c0_6 = arith.constant 0 : index
    %3 = vector.load %arg10[%c0_5, %c0_6] : memref<8x128xf32, #tpu.memory_space<vmem>>, vector<8x128xf32>
    %c0_7 = arith.constant 0 : index
    %c0_8 = arith.constant 0 : index
    %4 = vector.load %arg0[%c0_7, %c0_8] : memref<32x64xf32, #tpu.memory_space<vmem>>, vector<32x64xf32>
    %cst = arith.constant dense<0.000000e+00> : vector<32x64xf32>
    %5 = tpu.matmul %0, %4, %cst {dimension_numbers = #tpu.dot_dimension_numbers<[1], [0], [0], [1], [0, 0, 1, 1], [], []>} : vector<32x32xf32>, vector<32x64xf32>, vector<32x64xf32> -> vector<32x64xf32>
    %cst_9 = arith.constant dense<0.000000e+00> : vector<32x64xf32>
    %6 = tpu.matmul %1, %4, %cst_9 {dimension_numbers = #tpu.dot_dimension_numbers<[1], [0], [0], [1], [0, 0, 1, 1], [], []>} : vector<32x32xf32>, vector<32x64xf32>, vector<32x64xf32> -> vector<32x64xf32>
    %7 = arith.truncf %5 : vector<32x64xf32> to vector<32x64xbf16>
    %c0_10 = arith.constant 0 : index
    %c0_11 = arith.constant 0 : index
    %c0_12 = arith.constant 0 : index
    %8 = vector.load %arg3[%c0_10, %c0_11, %c0_12] : memref<3x64x128xbf16, #tpu.memory_space<vmem>>, vector<1x64x128xbf16>
    %9 = vector.shape_cast %8 : vector<1x64x128xbf16> to vector<64x128xbf16>
    %cst_13 = arith.constant dense<0.000000e+00> : vector<32x128xf32>
    %10 = tpu.matmul %7, %9, %cst_13 {dimension_numbers = #tpu.dot_dimension_numbers<[1], [0], [0], [1], [0, 0, 1, 1], [], []>} : vector<32x64xbf16>, vector<64x128xbf16>, vector<32x128xf32> -> vector<32x128xf32>
    %11 = arith.truncf %4 : vector<32x64xf32> to vector<32x64xbf16>
    %c1 = arith.constant 1 : index
    %c0_14 = arith.constant 0 : index
    %c0_15 = arith.constant 0 : index
    %12 = vector.load %arg3[%c1, %c0_14, %c0_15] : memref<3x64x128xbf16, #tpu.memory_space<vmem>>, vector<1x64x128xbf16>
    %13 = vector.shape_cast %12 : vector<1x64x128xbf16> to vector<64x128xbf16>
    %cst_16 = arith.constant dense<0.000000e+00> : vector<32x128xf32>
    %14 = tpu.matmul %11, %13, %cst_16 {dimension_numbers = #tpu.dot_dimension_numbers<[1], [0], [0], [1], [0, 0, 1, 1], [], []>} : vector<32x64xbf16>, vector<64x128xbf16>, vector<32x128xf32> -> vector<32x128xf32>
    %15 = arith.addf %10, %14 : vector<32x128xf32>
    %16 = arith.truncf %6 : vector<32x64xf32> to vector<32x64xbf16>
    %c2 = arith.constant 2 : index
    %c0_17 = arith.constant 0 : index
    %c0_18 = arith.constant 0 : index
    %17 = vector.load %arg3[%c2, %c0_17, %c0_18] : memref<3x64x128xbf16, #tpu.memory_space<vmem>>, vector<1x64x128xbf16>
    %18 = vector.shape_cast %17 : vector<1x64x128xbf16> to vector<64x128xbf16>
    %cst_19 = arith.constant dense<0.000000e+00> : vector<32x128xf32>
    %19 = tpu.matmul %16, %18, %cst_19 {dimension_numbers = #tpu.dot_dimension_numbers<[1], [0], [0], [1], [0, 0, 1, 1], [], []>} : vector<32x64xbf16>, vector<64x128xbf16>, vector<32x128xf32> -> vector<32x128xf32>
    %20 = arith.addf %15, %19 : vector<32x128xf32>
    %cst_20 = arith.constant dense<0.000000e+00> : vector<32x8xf32>
    %21 = tpu.matmul %20, %2, %cst_20 {dimension_numbers = #tpu.dot_dimension_numbers<[1], [0], [0], [1], [0, 0, 1, 1], [], []>} : vector<32x128xf32>, vector<128x8xf32>, vector<32x8xf32> -> vector<32x8xf32>
    %cst_21 = arith.constant dense<0.000000e+00> : vector<8xf32>
    %22 = vector.multi_reduction <add>, %21, %cst_21 [0] : vector<32x8xf32> to vector<8xf32>
    %23 = vector.shape_cast %22 : vector<8xf32> to vector<1x8xf32>
    %cst_22 = arith.constant 0.001953125 : f32
    %24 = vector.broadcast %cst_22 : f32 to vector<1x8xf32>
    %25 = arith.mulf %23, %24 : vector<1x8xf32>
    %cst_23 = arith.constant dense<0.000000e+00> : vector<1x128xf32>
    %26 = tpu.matmul %25, %3, %cst_23 {dimension_numbers = #tpu.dot_dimension_numbers<[1], [0], [0], [1], [0, 0, 1, 1], [], []>} : vector<1x8xf32>, vector<8x128xf32>, vector<1x128xf32> -> vector<1x128xf32>
    %27 = vector.broadcast %26 : vector<1x128xf32> to vector<32x128xf32>
    %28 = arith.subf %20, %27 : vector<32x128xf32>
    %29 = arith.mulf %28, %28 : vector<32x128xf32>
    %cst_24 = arith.constant dense<0.000000e+00> : vector<32x8xf32>
    %30 = tpu.matmul %29, %2, %cst_24 {dimension_numbers = #tpu.dot_dimension_numbers<[1], [0], [0], [1], [0, 0, 1, 1], [], []>} : vector<32x128xf32>, vector<128x8xf32>, vector<32x8xf32> -> vector<32x8xf32>
    %cst_25 = arith.constant dense<0.000000e+00> : vector<8xf32>
    %31 = vector.multi_reduction <add>, %30, %cst_25 [0] : vector<32x8xf32> to vector<8xf32>
    %32 = vector.shape_cast %31 : vector<8xf32> to vector<1x8xf32>
    %cst_26 = arith.constant 0.001953125 : f32
    %33 = vector.broadcast %cst_26 : f32 to vector<1x8xf32>
    %34 = arith.mulf %32, %33 : vector<1x8xf32>
    %c0_27 = arith.constant 0 : index
    %c0_28 = arith.constant 0 : index
    %35 = vector.load %arg4[%c0_27, %c0_28] : memref<1x8xf32, #tpu.memory_space<vmem>>, vector<1x8xf32>
    %cst_29 = arith.constant 9.99999974E-6 : f32
    %36 = vector.broadcast %cst_29 : f32 to vector<1x8xf32>
    %37 = arith.addf %34, %36 : vector<1x8xf32>
    %38 = math.rsqrt %37 : vector<1x8xf32>
    %39 = arith.mulf %35, %38 : vector<1x8xf32>
    %cst_30 = arith.constant dense<0.000000e+00> : vector<1x128xf32>
    %40 = tpu.matmul %39, %3, %cst_30 {dimension_numbers = #tpu.dot_dimension_numbers<[1], [0], [0], [1], [0, 0, 1, 1], [], []>} : vector<1x8xf32>, vector<8x128xf32>, vector<1x128xf32> -> vector<1x128xf32>
    %c0_31 = arith.constant 0 : index
    %c0_32 = arith.constant 0 : index
    %41 = vector.load %arg5[%c0_31, %c0_32] : memref<1x8xf32, #tpu.memory_space<vmem>>, vector<1x8xf32>
    %cst_33 = arith.constant dense<0.000000e+00> : vector<1x128xf32>
    %42 = tpu.matmul %41, %3, %cst_33 {dimension_numbers = #tpu.dot_dimension_numbers<[1], [0], [0], [1], [0, 0, 1, 1], [], []>} : vector<1x8xf32>, vector<8x128xf32>, vector<1x128xf32> -> vector<1x128xf32>
    %43 = vector.broadcast %40 : vector<1x128xf32> to vector<32x128xf32>
    %44 = arith.mulf %28, %43 : vector<32x128xf32>
    %45 = vector.broadcast %42 : vector<1x128xf32> to vector<32x128xf32>
    %46 = arith.addf %44, %45 : vector<32x128xf32>
    %cst_34 = arith.constant 0.000000e+00 : f32
    %47 = vector.broadcast %cst_34 : f32 to vector<32x128xf32>
    %48 = arith.maximumf %46, %47 : vector<32x128xf32>
    %cst_35 = arith.constant dense<0.000000e+00> : vector<32x128xf32>
    %49 = tpu.matmul %0, %48, %cst_35 {dimension_numbers = #tpu.dot_dimension_numbers<[1], [0], [0], [1], [0, 0, 1, 1], [], []>} : vector<32x32xf32>, vector<32x128xf32>, vector<32x128xf32> -> vector<32x128xf32>
    %cst_36 = arith.constant dense<0.000000e+00> : vector<32x128xf32>
    %50 = tpu.matmul %1, %48, %cst_36 {dimension_numbers = #tpu.dot_dimension_numbers<[1], [0], [0], [1], [0, 0, 1, 1], [], []>} : vector<32x32xf32>, vector<32x128xf32>, vector<32x128xf32> -> vector<32x128xf32>
    %51 = arith.truncf %49 : vector<32x128xf32> to vector<32x128xbf16>
    %c0_37 = arith.constant 0 : index
    %c0_38 = arith.constant 0 : index
    %c0_39 = arith.constant 0 : index
    %52 = vector.load %arg6[%c0_37, %c0_38, %c0_39] : memref<3x128x128xbf16, #tpu.memory_space<vmem>>, vector<1x128x128xbf16>
    %53 = vector.shape_cast %52 : vector<1x128x128xbf16> to vector<128x128xbf16>
    %cst_40 = arith.constant dense<0.000000e+00> : vector<32x128xf32>
    %54 = tpu.matmul %51, %53, %cst_40 {dimension_numbers = #tpu.dot_dimension_numbers<[1], [0], [0], [1], [0, 0, 1, 1], [], []>} : vector<32x128xbf16>, vector<128x128xbf16>, vector<32x128xf32> -> vector<32x128xf32>
    %55 = arith.truncf %48 : vector<32x128xf32> to vector<32x128xbf16>
    %c1_41 = arith.constant 1 : index
    %c0_42 = arith.constant 0 : index
    %c0_43 = arith.constant 0 : index
    %56 = vector.load %arg6[%c1_41, %c0_42, %c0_43] : memref<3x128x128xbf16, #tpu.memory_space<vmem>>, vector<1x128x128xbf16>
    %57 = vector.shape_cast %56 : vector<1x128x128xbf16> to vector<128x128xbf16>
    %cst_44 = arith.constant dense<0.000000e+00> : vector<32x128xf32>
    %58 = tpu.matmul %55, %57, %cst_44 {dimension_numbers = #tpu.dot_dimension_numbers<[1], [0], [0], [1], [0, 0, 1, 1], [], []>} : vector<32x128xbf16>, vector<128x128xbf16>, vector<32x128xf32> -> vector<32x128xf32>
    %59 = arith.addf %54, %58 : vector<32x128xf32>
    %60 = arith.truncf %50 : vector<32x128xf32> to vector<32x128xbf16>
    %c2_45 = arith.constant 2 : index
    %c0_46 = arith.constant 0 : index
    %c0_47 = arith.constant 0 : index
    %61 = vector.load %arg6[%c2_45, %c0_46, %c0_47] : memref<3x128x128xbf16, #tpu.memory_space<vmem>>, vector<1x128x128xbf16>
    %62 = vector.shape_cast %61 : vector<1x128x128xbf16> to vector<128x128xbf16>
    %cst_48 = arith.constant dense<0.000000e+00> : vector<32x128xf32>
    %63 = tpu.matmul %60, %62, %cst_48 {dimension_numbers = #tpu.dot_dimension_numbers<[1], [0], [0], [1], [0, 0, 1, 1], [], []>} : vector<32x128xbf16>, vector<128x128xbf16>, vector<32x128xf32> -> vector<32x128xf32>
    %64 = arith.addf %59, %63 : vector<32x128xf32>
    %cst_49 = arith.constant dense<0.000000e+00> : vector<32x8xf32>
    %65 = tpu.matmul %64, %2, %cst_49 {dimension_numbers = #tpu.dot_dimension_numbers<[1], [0], [0], [1], [0, 0, 1, 1], [], []>} : vector<32x128xf32>, vector<128x8xf32>, vector<32x8xf32> -> vector<32x8xf32>
    %cst_50 = arith.constant dense<0.000000e+00> : vector<8xf32>
    %66 = vector.multi_reduction <add>, %65, %cst_50 [0] : vector<32x8xf32> to vector<8xf32>
    %67 = vector.shape_cast %66 : vector<8xf32> to vector<1x8xf32>
    %cst_51 = arith.constant 0.001953125 : f32
    %68 = vector.broadcast %cst_51 : f32 to vector<1x8xf32>
    %69 = arith.mulf %67, %68 : vector<1x8xf32>
    %cst_52 = arith.constant dense<0.000000e+00> : vector<1x128xf32>
    %70 = tpu.matmul %69, %3, %cst_52 {dimension_numbers = #tpu.dot_dimension_numbers<[1], [0], [0], [1], [0, 0, 1, 1], [], []>} : vector<1x8xf32>, vector<8x128xf32>, vector<1x128xf32> -> vector<1x128xf32>
    %71 = vector.broadcast %70 : vector<1x128xf32> to vector<32x128xf32>
    %72 = arith.subf %64, %71 : vector<32x128xf32>
    %73 = arith.mulf %72, %72 : vector<32x128xf32>
    %cst_53 = arith.constant dense<0.000000e+00> : vector<32x8xf32>
    %74 = tpu.matmul %73, %2, %cst_53 {dimension_numbers = #tpu.dot_dimension_numbers<[1], [0], [0], [1], [0, 0, 1, 1], [], []>} : vector<32x128xf32>, vector<128x8xf32>, vector<32x8xf32> -> vector<32x8xf32>
    %cst_54 = arith.constant dense<0.000000e+00> : vector<8xf32>
    %75 = vector.multi_reduction <add>, %74, %cst_54 [0] : vector<32x8xf32> to vector<8xf32>
    %76 = vector.shape_cast %75 : vector<8xf32> to vector<1x8xf32>
    %cst_55 = arith.constant 0.001953125 : f32
    %77 = vector.broadcast %cst_55 : f32 to vector<1x8xf32>
    %78 = arith.mulf %76, %77 : vector<1x8xf32>
    %c0_56 = arith.constant 0 : index
    %c0_57 = arith.constant 0 : index
    %79 = vector.load %arg7[%c0_56, %c0_57] : memref<1x8xf32, #tpu.memory_space<vmem>>, vector<1x8xf32>
    %cst_58 = arith.constant 9.99999974E-6 : f32
    %80 = vector.broadcast %cst_58 : f32 to vector<1x8xf32>
    %81 = arith.addf %78, %80 : vector<1x8xf32>
    %82 = math.rsqrt %81 : vector<1x8xf32>
    %83 = arith.mulf %79, %82 : vector<1x8xf32>
    %cst_59 = arith.constant dense<0.000000e+00> : vector<1x128xf32>
    %84 = tpu.matmul %83, %3, %cst_59 {dimension_numbers = #tpu.dot_dimension_numbers<[1], [0], [0], [1], [0, 0, 1, 1], [], []>} : vector<1x8xf32>, vector<8x128xf32>, vector<1x128xf32> -> vector<1x128xf32>
    %c0_60 = arith.constant 0 : index
    %c0_61 = arith.constant 0 : index
    %85 = vector.load %arg8[%c0_60, %c0_61] : memref<1x8xf32, #tpu.memory_space<vmem>>, vector<1x8xf32>
    %cst_62 = arith.constant dense<0.000000e+00> : vector<1x128xf32>
    %86 = tpu.matmul %85, %3, %cst_62 {dimension_numbers = #tpu.dot_dimension_numbers<[1], [0], [0], [1], [0, 0, 1, 1], [], []>} : vector<1x8xf32>, vector<8x128xf32>, vector<1x128xf32> -> vector<1x128xf32>
    %87 = vector.broadcast %84 : vector<1x128xf32> to vector<32x128xf32>
    %88 = arith.mulf %72, %87 : vector<32x128xf32>
    %89 = vector.broadcast %86 : vector<1x128xf32> to vector<32x128xf32>
    %90 = arith.addf %88, %89 : vector<32x128xf32>
    %cst_63 = arith.constant 0.000000e+00 : f32
    %91 = vector.broadcast %cst_63 : f32 to vector<32x128xf32>
    %92 = arith.maximumf %90, %91 : vector<32x128xf32>
    %cst_64 = arith.constant dense<0.000000e+00> : vector<32x128xf32>
    %93 = tpu.matmul %1, %92, %cst_64 {dimension_numbers = #tpu.dot_dimension_numbers<[1], [0], [0], [1], [0, 0, 1, 1], [], []>} : vector<32x32xf32>, vector<32x128xf32>, vector<32x128xf32> -> vector<32x128xf32>
    %94 = arith.maximumf %92, %93 : vector<32x128xf32>
    %c0_65 = arith.constant 0 : index
    %c0_66 = arith.constant 0 : index
    %95 = vector.load %arg11[%c0_65, %c0_66] : memref<16x32xf32, #tpu.memory_space<vmem>>, vector<16x32xf32>
    %cst_67 = arith.constant dense<0.000000e+00> : vector<16x128xf32>
    %96 = tpu.matmul %95, %94, %cst_67 {dimension_numbers = #tpu.dot_dimension_numbers<[1], [0], [0], [1], [0, 0, 1, 1], [], []>} : vector<16x32xf32>, vector<32x128xf32>, vector<16x128xf32> -> vector<16x128xf32>
    %c0_68 = arith.constant 0 : index
    %c0_69 = arith.constant 0 : index
    %97 = vector.load %arg12[%c0_68, %c0_69] : memref<128x128xf32, #tpu.memory_space<vmem>>, vector<128x128xf32>
    %cst_70 = arith.constant dense<0.000000e+00> : vector<16x128xf32>
    %98 = tpu.matmul %96, %97, %cst_70 {dimension_numbers = #tpu.dot_dimension_numbers<[1], [0], [0], [1], [0, 0, 1, 1], [], []>} : vector<16x128xf32>, vector<128x128xf32>, vector<16x128xf32> -> vector<16x128xf32>
    %99 = arith.maximumf %96, %98 : vector<16x128xf32>
    %c0_71 = arith.constant 0 : index
    %c0_72 = arith.constant 0 : index
    %100 = vector.load %arg13[%c0_71, %c0_72] : memref<128x64xf32, #tpu.memory_space<vmem>>, vector<128x64xf32>
    %cst_73 = arith.constant dense<0.000000e+00> : vector<16x64xf32>
    %101 = tpu.matmul %99, %100, %cst_73 {dimension_numbers = #tpu.dot_dimension_numbers<[1], [0], [0], [1], [0, 0, 1, 1], [], []>} : vector<16x128xf32>, vector<128x64xf32>, vector<16x64xf32> -> vector<16x64xf32>
    %c0_74 = arith.constant 0 : index
    %c0_75 = arith.constant 0 : index
    %102 = vector.load %arg14[%c0_74, %c0_75] : memref<16x64xf32, #tpu.memory_space<vmem>>, vector<16x64xf32>
    tpu.vector_store %arg14[%c0_74, %c0_75], %101 {strides = array<i32>} : memref<16x64xf32, #tpu.memory_space<vmem>>, vector<16x64xf32>,
    return
  }
}

</mosaic_0001>

<bundles_post_ra>
// kernel: conv_block_forward.1
= control target key start
LH: loop header
LB: loop body
LE: loop exit
PB: predicated region body
PF: predicated region fallthrough
CT: control target
= control target key end

     0   :  { %vm77_vm0 = vcmask 261120   ;;  %vm205_vm1 = vcmask 523264   ;;  %vm373_vm2 = vcmask 64512   ;;  %s2066_s0 = inlined_call_operand.vmem [shape: f32[32,64], index: 0, kind: input, shape index: {}]   ;;  %s2067_s1 = inlined_call_operand.vmem [shape: f32[32,32], index: 1, kind: input, shape index: {}]   ;;  %s2068_s3 = inlined_call_operand.vmem [shape: bf16[3,64,128], index: 3, kind: input, shape index: {}]   ;;  %s2069_s2 = inlined_call_operand.vmem [shape: f32[32,32], index: 2, kind: input, shape index: {}]   ;;  %s2070_s9 = inlined_call_operand.vmem [shape: f32[128,8], index: 9, kind: input, shape index: {}]   ;;  %s2071_s10 = inlined_call_operand.vmem [shape: f32[8,128], index: 10, kind: input, shape index: {}]   ;;  %s2072_s6 = inlined_call_operand.vmem [shape: bf16[3,128,128], index: 6, kind: input, shape index: {}]   ;;  %s2073_s4 = inlined_call_operand.vmem [shape: f32[1,8], index: 4, kind: input, shape index: {}]   ;;  %s2074_s5 = inlined_call_operand.vmem [shape: f32[1,8], index: 5, kind: input, shape index: {}]   ;;  %s2075_s7 = inlined_call_operand.vmem [shape: f32[1,8], index: 7, kind: input, shape index: {}]   ;;  %s2076_s8 = inlined_call_operand.vmem [shape: f32[1,8], index: 8, kind: input, shape index: {}]   ;;  %s2077_s12 = inlined_call_operand.vmem [shape: f32[128,128], index: 12, kind: input, shape index: {}]   ;;  %s2078_s11 = inlined_call_operand.vmem [shape: f32[16,32], index: 11, kind: input, shape index: {}]   ;;  %s2079_s13 = inlined_call_operand.vmem [shape: f32[128,64], index: 13, kind: input, shape index: {}]   ;;  %s2080_s14 = inlined_call_operand.vmem [shape: f32[16,64], index: 14, kind: output, shape index: {}]  }
   0x1   :  { %v76_v0 = vld [vmem:[%s2066_s0 + $0x18] sm:$0xff]  ;;  %v75_v1 = vld [vmem:[%s2066_s0 + $0x10] sm:$0xff]  ;;  %v74_v2 = vld [vmem:[%s2066_s0 + $0x8] sm:$0xff] }
   0x2   :  { %102 = vmatpush.msra.mxu0 %v76_v0  ;;  %143 = vmatpush.msra.mxu1 %v76_v0  ;;  %v73_v3 = vld [vmem:[%s2066_s0] sm:$0xff]  ;;  %v1431_v5 = vld [vmem:[%s2068_s3 + $0x38] sm:$0xff]  ;;  %v1430_v9 = vld [vmem:[%s2068_s3 + $0x30] sm:$0xff]  ;;  %v171_v25 = vpack.c.bf16 %v76_v0, %v75_v1 }
   0x3   :  { %v1554_v4 = vld [vmem:[%s2067_s1] sm:$0xff]  ;;  %v1427_v7 = vld [vmem:[%s2068_s3 + $0x18] sm:$0xff]  ;;  %216 = vmatpush.bf16.msra.mxu2 %v1431_v5  ;;  %v1429_v10 = vld [vmem:[%s2068_s3 + $0x28] sm:$0xff]  ;;  %v170_v20 = vpack.c.bf16 %v74_v2, %v73_v3 }
   0x4   :  { %103 = vmatpush.msra.mxu0 %v75_v1  ;;  %144 = vmatpush.msra.mxu1 %v75_v1  ;;  %v1562_v6 = vld [vmem:[%s2069_s2] sm:$0xff]  ;;  %v1435_v8 = vld [vmem:[%s2068_s3 + $0x58] sm:$0xff]  ;;  %v1583_v11 = vld [vmem:[%s2067_s1 + $0x8] sm:$0xff] }
   0x5   :  { %265 = vmatpush.bf16.msra.mxu3 %v1427_v7  ;;  %v1588_v12 = vld [vmem:[%s2069_s2 + $0x8] sm:$0xff]  ;;  %v1597_v13 = vld [vmem:[%s2067_s1 + $0x10] sm:$0xff]  ;;  %v1611_v15 = vld [vmem:[%s2067_s1 + $0x18] sm:$0xff] }
   0x6   :  { %104 = vmatpush.msra.mxu0 %v74_v2  ;;  %145 = vmatpush.msra.mxu1 %v74_v2  ;;  %v1602_v14 = vld [vmem:[%s2069_s2 + $0x10] sm:$0xff]  ;;  %v1616_v16 = vld [vmem:[%s2069_s2 + $0x18] sm:$0xff]  ;;  %v1428_v17 = vld [vmem:[%s2068_s3 + $0x20] sm:$0xff] }
   0x7   :  { %217 = vmatpush.bf16.msra.mxu2 %v1430_v9  ;;  %v1426_v18 = vld [vmem:[%s2068_s3 + $0x10] sm:$0xff]  ;;  %v1425_v21 = vld [vmem:[%s2068_s3 + $0x8] sm:$0xff]  ;;  %v1424_v23 = vld [vmem:[%s2068_s3] sm:$0xff] }
   0x8   :  { %105 = vmatpush.msra.mxu0 %v73_v3  ;;  %146 = vmatpush.msra.mxu1 %v73_v3  ;;  %v1434_v19 = vld [vmem:[%s2068_s3 + $0x50] sm:$0xff]  ;;  %v1433_v22 = vld [vmem:[%s2068_s3 + $0x48] sm:$0xff]  ;;  %v1432_v24 = vld [vmem:[%s2068_s3 + $0x40] sm:$0xff] }
   0x9   :  { %1198 = vmatmul.msk.f32.vlgmr.msra.gmra.mxu0 %vm77_vm0, %v1554_v4  ;;  %1202 = vmatmul.msk.f32.vlgmr.msra.gmra.mxu1 %vm77_vm0, %v1562_v6  ;;  %v1648_v26 = vld [vmem:[%s2070_s9 + $0x78] sm:$0xff]  ;;  %v1653_v27 = vld [vmem:[%s2070_s9 + $0x70] sm:$0xff]  ;;  %v1660_v28 = vld [vmem:[%s2070_s9 + $0x68] sm:$0xff] }
   0xa   :  { %325 = vmatpush.bf16.msrb.mxu0 %v1435_v8  ;;  %266 = vmatpush.bf16.msra.mxu3 %v1426_v18  ;;  %v1667_v29 = vld [vmem:[%s2070_s9 + $0x60] sm:$0xff]  ;;  %v1674_v32 = vld [vmem:[%s2070_s9 + $0x58] sm:$0xff]  ;;  %v1681_v33 = vld [vmem:[%s2070_s9 + $0x50] sm:$0xff] }
   0xb   :  { %218 = vmatpush.bf16.msra.mxu2 %v1429_v10  ;;  %344 = vmatpush.msrb.mxu1 %v1648_v26  ;;  %v1688_v34 = vld [vmem:[%s2070_s9 + $0x48] sm:$0xff]  ;;  %v1695_v35 = vld [vmem:[%s2070_s9 + $0x40] sm:$0xff]  ;;  %v1702_v40 = vld [vmem:[%s2070_s9 + $0x38] sm:$0xff] }
   0xc   :  { %v1715_v47 = vld [vmem:[%s2070_s9 + $0x30] sm:$0xff]  ;;  %v1722_v48 = vld [vmem:[%s2070_s9 + $0x28] sm:$0xff]  ;;  %v1728_v49 = vld [vmem:[%s2070_s9 + $0x20] sm:$0xff] }
   0xd   :  { %345 = vmatpush.msrb.mxu1 %v1653_v27  ;;  %v1734_v50 = vld [vmem:[%s2070_s9 + $0x18] sm:$0xff]  ;;  %v1743_v51 = vld [vmem:[%s2070_s9 + $0x10] sm:$0xff]  ;;  %v1750_v52 = vld [vmem:[%s2070_s9 + $0x8] sm:$0xff] }
   0xe   :  { %326 = vmatpush.bf16.msrb.mxu0 %v1434_v19  ;;  %267 = vmatpush.bf16.msra.mxu3 %v1425_v21  ;;  %v1757_v53 = vld [vmem:[%s2070_s9] sm:$0xff] }
   0xf   :  { %219 = vmatpush.bf16.msra.mxu2 %v1428_v17  ;;  %346 = vmatpush.msrb.mxu1 %v1660_v28 }
  0x11   :  { %1199 = vmatmul.msk.f32.gmra.mxu0 %vm77_vm0, %v1583_v11  ;;  %1203 = vmatmul.msk.f32.gmra.mxu1 %vm77_vm0, %v1588_v12 }
  0x12   :  { %1230 = vmatmul.msk.bf16.vlgmr.msra.gmra.mxu2 %vm205_vm1, %v170_v20  ;;  %327 = vmatpush.bf16.msrb.mxu0 %v1433_v22  ;;  %v1764_v20 = vld [vmem:[%s2071_s10] sm:$0xff] }
  0x13   :  { %268 = vmatpush.bf16.msra.mxu3 %v1424_v23  ;;  %347 = vmatpush.msrb.mxu1 %v1667_v29 }
  0x14   :  { %494 = vmatpush.msrb.mxu2 %v1764_v20 }
  0x15   :  { %348 = vmatpush.msrb.mxu1 %v1674_v32 }
  0x16   :  { %328 = vmatpush.bf16.msrb.mxu0 %v1432_v24  ;;  %518 = vmatpush.msra.mxu2 %v1764_v20 }
  0x17   :  { %420 = vmatpush.msrb.mxu3 %v1648_v26  ;;  %349 = vmatpush.msrb.mxu1 %v1681_v33 }
  0x19   :  { %1200 = vmatmul.msk.f32.gmra.mxu0 %vm77_vm0, %v1597_v13  ;;  %1204 = vmatmul.msk.f32.gmra.mxu1 %vm77_vm0, %v1602_v14 }
  0x1a   :  { %421 = vmatpush.msrb.mxu3 %v1653_v27  ;;  %350 = vmatpush.msrb.mxu1 %v1688_v34 }
  0x1c   :  { %422 = vmatpush.msrb.mxu3 %v1660_v28  ;;  %351 = vmatpush.msrb.mxu1 %v1695_v35 }
  0x1e   :  { %423 = vmatpush.msrb.mxu3 %v1667_v29  ;;  %352 = vmatpush.msrb.mxu1 %v1702_v40 }
  0x20   :  { %424 = vmatpush.msrb.mxu3 %v1674_v32  ;;  %353 = vmatpush.msrb.mxu1 %v1715_v47 }
  0x21   :  { %1201 = vmatmul.msk.f32.gmra.mxu0 %vm77_vm0, %v1611_v15  ;;  %1205 = vmatmul.msk.f32.gmra.mxu1 %vm77_vm0, %v1616_v16 }
  0x22   :  { %1231 = vmatmul.msk.bf16.gmra.mxu2 %vm205_vm1, %v171_v25  ;;  %425 = vmatpush.msrb.mxu3 %v1681_v33 }
  0x23   :  { %354 = vmatpush.msrb.mxu1 %v1722_v48 }
  0x24   :  { %426 = vmatpush.msrb.mxu3 %v1688_v34 }
  0x25   :  { %355 = vmatpush.msrb.mxu1 %v1728_v49 }
  0x26   :  { %427 = vmatpush.msrb.mxu3 %v1695_v35 }
  0x27   :  { %356 = vmatpush.msrb.mxu1 %v1734_v50 }
  0x28   :  { %428 = vmatpush.msrb.mxu3 %v1702_v40 }
  0x29   :  { %357 = vmatpush.msrb.mxu1 %v1743_v51 }
  0x2a   :  { %429 = vmatpush.msrb.mxu3 %v1715_v47 }
  0x2b   :  { %358 = vmatpush.msrb.mxu1 %v1750_v52 }
  0x2c   :  { %430 = vmatpush.msrb.mxu3 %v1722_v48 }
  0x2d   :  { %359 = vmatpush.msrb.mxu1 %v1757_v53 }
  0x2e   :  { %431 = vmatpush.msrb.mxu3 %v1728_v49 }
  0x2f   :  { %406 = vmatpush.msra.mxu1 %v1764_v20 }
  0x30   :  { %432 = vmatpush.msrb.mxu3 %v1734_v50 }
  0x32   :  { %433 = vmatpush.msrb.mxu3 %v1743_v51 }
  0x34   :  { %434 = vmatpush.msrb.mxu3 %v1750_v52 }
  0x36   :  { %435 = vmatpush.msrb.mxu3 %v1757_v53 }
  0x86   :  { %v107_v30 = vpop.f32.mrf.mxu0  ;;  %v148_v31 = vpop.f32.mrf.mxu1 }
  0x8e   :  { %v110_v36 = vpop.f32.mrf.mxu0  ;;  %v151_v37 = vpop.f32.mrf.mxu1 }
  0x8f   :  { %v160_v38 = vpack.c.bf16 %v110_v36, %v107_v30  ;;  %v280_v39 = vpack.c.bf16 %v151_v37, %v148_v31 }
  0x91   :  { %1248 = vmatmul.msk.bf16.vlgmr.msra.gmra.mxu3 %vm205_vm1, %v160_v38  ;;  %1274 = vmatmul.msk.bf16.vlgmr.msrb.gmra.mxu0 %vm205_vm1, %v280_v39 }
  0x95   :  { %v221_v54 = vpop.f32.mrf.mxu2 }
  0x96   :  { %v113_v41 = vpop.f32.mrf.mxu0  ;;  %v154_v42 = vpop.f32.mrf.mxu1 }
  0x9d   :  { %v223_v59 = vpop.f32.mrf.mxu2 }
  0x9e   :  { %v116_v43 = vpop.f32.mrf.mxu0  ;;  %v157_v44 = vpop.f32.mrf.mxu1 }
  0x9f   :  { %v161_v45 = vpack.c.bf16 %v116_v43, %v113_v41  ;;  %v281_v46 = vpack.c.bf16 %v157_v44, %v154_v42 }
  0xa1   :  { %1249 = vmatmul.msk.bf16.gmra.mxu3 %vm205_vm1, %v161_v45  ;;  %1275 = vmatmul.msk.bf16.gmra.mxu0 %vm205_vm1, %v281_v46 }
  0xa5   :  { %v226_v0 = vpop.f32.mrf.mxu2 }
  0xad   :  { %v228_v7 = vpop.f32.mrf.mxu2 }
 0x10e   :  { %v330_v55 = vpop.f32.mrf.mxu0 }
 0x114   :  { %v270_v56 = vpop.f32.mrf.mxu3 }
 0x115   :  { %v271_v57 = vadd.f32 %v270_v56, %v221_v54 }
 0x116   :  { %v332_v60 = vpop.f32.mrf.mxu0 }
 0x117   :  { %v340_v58 = vadd.f32 %v330_v55, %v271_v57 }
 0x119   :  { %360 = vmatmul.f32.vlgmr.msrb.gmra.mxu1 %v340_v58 }
 0x11c   :  { %v272_v61 = vpop.f32.mrf.mxu3 }
 0x11d   :  { %v273_v62 = vadd.f32 %v272_v61, %v223_v59 }
 0x11e   :  { %v335_v1 = vpop.f32.mrf.mxu0 }
 0x11f   :  { %v341_v63 = vadd.f32 %v332_v60, %v273_v62 }
 0x121   :  { %363 = vmatmul.f32.gmra.mxu1 %v341_v63 }
 0x124   :  { %v275_v2 = vpop.f32.mrf.mxu3 }
 0x125   :  { %v276_v3 = vadd.f32 %v275_v2, %v226_v0 }
 0x126   :  { %v337_v10 = vpop.f32.mrf.mxu0 }
 0x127   :  { %v342_v5 = vadd.f32 %v335_v1, %v276_v3 }
 0x129   :  { %366 = vmatmul.f32.gmra.mxu1 %v342_v5 }
 0x12c   :  { %v277_v8 = vpop.f32.mrf.mxu3 }
 0x12d   :  { %v278_v9 = vadd.f32 %v277_v8, %v228_v7 }
 0x12f   :  { %v343_v17 = vadd.f32 %v337_v10, %v278_v9 }
 0x131   :  { %369 = vmatmul.f32.gmra.mxu1 %v343_v17 }
 0x196   :  { %v361_v18 = vpop.f32.mrf.mxu1 }
 0x197   :  { %v374_v23 = vsel %vm373_vm2, %v361_v18, 0.0 }
 0x19e   :  { %v364_v19 = vpop.f32.mrf.mxu1 }
 0x19f   :  { %v375_v22 = vsel %vm373_vm2, %v364_v19, 0.0 }
 0x1a0   :  { %v376_v25 = vadd.f32 %v375_v22, %v374_v23 }
 0x1a6   :  { %v367_v21 = vpop.f32.mrf.mxu1 }
 0x1a7   :  { %v377_v24 = vsel %vm373_vm2, %v367_v21, 0.0 }
 0x1a8   :  { %v378_v30 = vadd.f32 %v377_v24, %v376_v25 }
 0x1ae   :  { %v370_v31 = vpop.f32.mrf.mxu1 }
 0x1af   :  { %v379_v36 = vsel %vm373_vm2, %v370_v31, 0.0 }
 0x1b0   :  { %v380_v37 = vadd.f32 %v379_v36, %v378_v30  ;;  %v1451_v30 = vld [vmem:[%s2072_s6 + $0x78] sm:$0xff]  ;;  %v1450_v36 = vld [vmem:[%s2072_s6 + $0x70] sm:$0xff] }
 0x1b1   :  { %680 = vmatpush.bf16.msra.mxu3 %v1451_v30  ;;  %v1441_v30 = vld [vmem:[%s2072_s6 + $0x28] sm:$0xff] }
 0x1b2   :  { %v381_v38 = vrot.slane %v380_v37, 4 }
 0x1b4   :  { %v382_v39 = vadd.f32 %v381_v38, %v380_v37  ;;  %v1449_v37 = vld [vmem:[%s2072_s6 + $0x68] sm:$0xff] }
 0x1b5   :  { %681 = vmatpush.bf16.msra.mxu3 %v1450_v36  ;;  %v1440_v36 = vld [vmem:[%s2072_s6 + $0x20] sm:$0xff] }
 0x1b6   :  { %v383_v41 = vrot.slane %v382_v39, 2 }
 0x1b8   :  { %v384_v42 = vadd.f32 %v383_v41, %v382_v39  ;;  %v1448_v39 = vld [vmem:[%s2072_s6 + $0x60] sm:$0xff] }
 0x1b9   :  { %682 = vmatpush.bf16.msra.mxu3 %v1449_v37  ;;  %v1439_v37 = vld [vmem:[%s2072_s6 + $0x18] sm:$0xff] }
 0x1ba   :  { %v385_v43 = vrot.slane %v384_v42, 1 }
 0x1bc   :  { %v386_v44 = vadd.f32 %v385_v43, %v384_v42 }
 0x1bd   :  { %683 = vmatpush.bf16.msra.mxu3 %v1448_v39 }
 0x1be   :  { %v387_v45 = vmul.f32 0.001953125, %v386_v44 }
 0x1c0   :  { %1276 = vmatmul.msk.f32.vlgmr.msra.gmra.mxu1 %vm373_vm2, %v387_v45  ;;  %v463_v45 = vld [vmem:[%s2073_s4] sm:$0x1] }
 0x23d   :  { %v408_v46 = vpop.f32.mrf.mxu1 }
 0x23e   :  { %v411_v54 = vperm.slane %v408_v46, 0 }
 0x240   :  { %v1774_v55 = vsub.f32 %v340_v58, %v411_v54  ;;  %v1778_v57 = vsub.f32 %v341_v63, %v411_v54  ;;  %v1782_v60 = vsub.f32 %v342_v5, %v411_v54  ;;  %v1786_v62 = vsub.f32 %v343_v17, %v411_v54 }
 0x242   :  { %v416_v56 = vmul.f32 %v1774_v55, %v1774_v55  ;;  %v417_v59 = vmul.f32 %v1778_v57, %v1778_v57  ;;  %v418_v61 = vmul.f32 %v1782_v60, %v1782_v60  ;;  %v419_v58 = vmul.f32 %v1786_v62, %v1786_v62 }
 0x244   :  { %436 = vmatmul.f32.vlgmr.msrb.gmra.mxu3 %v416_v56 }
 0x24c   :  { %439 = vmatmul.f32.gmra.mxu3 %v417_v59  ;;  %v499_v59 = vld [vmem:[%s2074_s5] sm:$0x1] }
 0x254   :  { %442 = vmatmul.f32.gmra.mxu3 %v418_v61  ;;  %v1447_v61 = vld [vmem:[%s2072_s6 + $0x58] sm:$0xff] }
 0x255   :  { %684 = vmatpush.bf16.msra.mxu3 %v1447_v61 }
 0x25c   :  { %445 = vmatmul.f32.gmra.mxu3 %v419_v58  ;;  %v1446_v58 = vld [vmem:[%s2072_s6 + $0x50] sm:$0xff] }
 0x25d   :  { %685 = vmatpush.bf16.msra.mxu3 %v1446_v58 }
 0x2c7   :  { %v437_v0 = vpop.f32.mrf.mxu3 }
 0x2c8   :  { %v449_v3 = vsel %vm373_vm2, %v437_v0, 0.0  ;;  %v1445_v0 = vld [vmem:[%s2072_s6 + $0x48] sm:$0xff] }
 0x2c9   :  { %686 = vmatpush.bf16.msra.mxu3 %v1445_v0 }
 0x2cf   :  { %v440_v1 = vpop.f32.mrf.mxu3 }
 0x2d0   :  { %v450_v2 = vsel %vm373_vm2, %v440_v1, 0.0  ;;  %v1444_v1 = vld [vmem:[%s2072_s6 + $0x40] sm:$0xff] }
 0x2d1   :  { %v451_v7 = vadd.f32 %v450_v2, %v449_v3  ;;  %687 = vmatpush.bf16.msra.mxu3 %v1444_v1 }
 0x2d5   :  { %1005 = vmatpush.msrb.mxu3 %v1764_v20 }
 0x2d7   :  { %v443_v63 = vpop.f32.mrf.mxu3 }
 0x2d8   :  { %v452_v5 = vsel %vm373_vm2, %v443_v63, 0.0 }
 0x2d9   :  { %v453_v8 = vadd.f32 %v452_v5, %v451_v7 }
 0x2df   :  { %v446_v9 = vpop.f32.mrf.mxu3 }
 0x2e0   :  { %v454_v10 = vsel %vm373_vm2, %v446_v9, 0.0 }
 0x2e1   :  { %v455_v17 = vadd.f32 %v454_v10, %v453_v8 }
 0x2e3   :  { %v456_v18 = vrot.slane %v455_v17, 4 }
 0x2e5   :  { %v457_v19 = vadd.f32 %v456_v18, %v455_v17 }
 0x2e7   :  { %v458_v21 = vrot.slane %v457_v19, 2 }
 0x2e9   :  { %v459_v22 = vadd.f32 %v458_v21, %v457_v19 }
 0x2eb   :  { %v460_v23 = vrot.slane %v459_v22, 1 }
 0x2ed   :  { %v461_v24 = vadd.f32 %v460_v23, %v459_v22 }
 0x2ef   :  { %v462_v25 = vmul.f32 0.001953125, %v461_v24 }
 0x2f1   :  { %v464_v31 = vadd.f32 1e-05, %v462_v25  ;;  %v1443_v25 = vld [vmem:[%s2072_s6 + $0x38] sm:$0xff] }
 0x2f3   :  { %1460 = vrsqrt.f32 %v464_v31  ;;  %vm471_vm4 = vweird.f32 %v464_v31 }
 0x2f9   :  { %v1461_v38 = vpop.eup %1460 }
 0x2fa   :  { %v466_v41 = vmul.f32 %v1461_v38, %v464_v31  ;;  %vm472_vm3 = vweird.f32 %v1461_v38  ;;  %v1458_v31 = vld [vmem:[%s2072_s6 + $0xb0] sm:$0xff] }
 0x2fb   :  { %vm473_vm5 = vmor %vm471_vm4, %vm472_vm3 }
 0x2fc   :  { %v467_v42 = vmul.f32 %v1461_v38, %v466_v41  ;;  %v1437_v41 = vld [vmem:[%s2072_s6 + $0x8] sm:$0xff] }
 0x2fe   :  { %v468_v43 = vmul.f32 0.5, %v467_v42  ;;  %v1453_v42 = vld [vmem:[%s2072_s6 + $0x88] sm:$0xff] }
 0x300   :  { %v469_v44 = vsub.f32 1.5, %v468_v43  ;;  %v1452_v43 = vld [vmem:[%s2072_s6 + $0x80] sm:$0xff] }
 0x302   :  { %v470_v46 = vmul.f32 %v1461_v38, %v469_v44 }
 0x304   :  { %v474_v54 = vsel %vm473_vm5, %v1461_v38, %v470_v46  ;;  %v1456_v38 = vld [vmem:[%s2072_s6 + $0xa0] sm:$0xff] }
 0x305   :  { %v475_v56 = vmul.f32 %v474_v54, %v463_v45 }
 0x307   :  { %1277 = vmatmul.msk.f32.vlgmr.msrb.gmra.mxu2 %vm373_vm2, %v475_v56 }
 0x308   :  { %747 = vmatpush.bf16.msrb.mxu2 %v1443_v25 }
 0x30f   :  { %1278 = vmatmul.msk.f32.vlgmr.msra.gmra.mxu2 %vm373_vm2, %v499_v59 }
 0x38a   :  { %v496_v63 = vpop.f32.mrf.mxu2 }
 0x38b   :  { %v523_v2 = vperm.slane %v496_v63, 0 }
 0x38d   :  { %v524_v3 = vmul.f32 %v523_v2, %v1774_v55  ;;  %v525_v7 = vmul.f32 %v523_v2, %v1778_v57  ;;  %v527_v8 = vmul.f32 %v523_v2, %v1786_v62  ;;  %v526_v10 = vmul.f32 %v523_v2, %v1782_v60  ;;  %v1442_v60 = vld [vmem:[%s2072_s6 + $0x30] sm:$0xff]  ;;  %v1459_v62 = vld [vmem:[%s2072_s6 + $0xb8] sm:$0xff] }
 0x38e   :  { %748 = vmatpush.bf16.msrb.mxu2 %v1442_v60 }
 0x392   :  { %v520_v5 = vpop.f32.mrf.mxu2  ;;  %749 = vmatpush.bf16.msrb.mxu2 %v1441_v30 }
 0x393   :  { %v528_v9 = vperm.slane %v520_v5, 0 }
 0x395   :  { %v529_v17 = vadd.f32 %v528_v9, %v524_v3  ;;  %v530_v18 = vadd.f32 %v528_v9, %v525_v7  ;;  %v532_v19 = vadd.f32 %v528_v9, %v527_v8  ;;  %v531_v21 = vadd.f32 %v528_v9, %v526_v10 }
 0x396   :  { %750 = vmatpush.bf16.msrb.mxu2 %v1440_v36 }
 0x397   :  { %v533_v22 = vmax.f32 %v529_v17, 0.0  ;;  %v534_v23 = vmax.f32 %v530_v18, 0.0  ;;  %v536_v24 = vmax.f32 %v532_v19, 0.0  ;;  %v535_v55 = vmax.f32 %v531_v21, 0.0 }
 0x399   :  { %549 = vmatpush.msra.mxu0 %v536_v24  ;;  %578 = vmatpush.msrb.mxu1 %v536_v24  ;;  %v613_v57 = vpack.c.bf16 %v534_v23, %v533_v22  ;;  %v614_v39 = vpack.c.bf16 %v536_v24, %v535_v55 }
 0x39a   :  { %751 = vmatpush.bf16.msrb.mxu2 %v1439_v37 }
 0x39b   :  { %550 = vmatpush.msra.mxu0 %v535_v55  ;;  %579 = vmatpush.msrb.mxu1 %v535_v55 }
 0x39c   :  { %688 = vmatmul.bf16.vlgmr.msra.gmra.mxu3 %v613_v57 }
 0x39d   :  { %551 = vmatpush.msra.mxu0 %v534_v23  ;;  %580 = vmatpush.msrb.mxu1 %v534_v23 }
 0x39e   :  { %1029 = vmatpush.msra.mxu3 %v1764_v20 }
 0x39f   :  { %552 = vmatpush.msra.mxu0 %v533_v22  ;;  %581 = vmatpush.msrb.mxu1 %v533_v22 }
 0x3a0   :  { %1279 = vmatmul.msk.f32.vlgmr.msra.gmra.mxu0 %vm77_vm0, %v1554_v4  ;;  %1283 = vmatmul.msk.f32.vlgmr.msrb.gmra.mxu1 %vm77_vm0, %v1562_v6  ;;  %v1457_v4 = vld [vmem:[%s2072_s6 + $0xa8] sm:$0xff] }
 0x3a1   :  { %833 = vmatpush.bf16.msrb.mxu0 %v1459_v62  ;;  %856 = vmatpush.msra.mxu1 %v1648_v26 }
 0x3a3   :  { %857 = vmatpush.msra.mxu1 %v1653_v27 }
 0x3a5   :  { %834 = vmatpush.bf16.msrb.mxu0 %v1458_v31  ;;  %858 = vmatpush.msra.mxu1 %v1660_v28 }
 0x3a7   :  { %859 = vmatpush.msra.mxu1 %v1667_v29 }
 0x3a8   :  { %1280 = vmatmul.msk.f32.gmra.mxu0 %vm77_vm0, %v1583_v11  ;;  %1284 = vmatmul.msk.f32.gmra.mxu1 %vm77_vm0, %v1588_v12  ;;  %v1455_v11 = vld [vmem:[%s2072_s6 + $0x98] sm:$0xff] }
 0x3a9   :  { %835 = vmatpush.bf16.msrb.mxu0 %v1457_v4  ;;  %860 = vmatpush.msra.mxu1 %v1674_v32 }
 0x3ab   :  { %861 = vmatpush.msra.mxu1 %v1681_v33 }
 0x3ac   :  { %693 = vmatmul.bf16.gmra.mxu3 %v614_v39 }
 0x3ad   :  { %836 = vmatpush.bf16.msrb.mxu0 %v1456_v38  ;;  %862 = vmatpush.msra.mxu1 %v1688_v34 }
 0x3af   :  { %863 = vmatpush.msra.mxu1 %v1695_v35 }
 0x3b0   :  { %1281 = vmatmul.msk.f32.gmra.mxu0 %vm77_vm0, %v1597_v13  ;;  %1285 = vmatmul.msk.f32.gmra.mxu1 %vm77_vm0, %v1602_v14  ;;  %v1438_v13 = vld [vmem:[%s2072_s6 + $0x10] sm:$0xff] }
 0x3b1   :  { %837 = vmatpush.bf16.msrb.mxu0 %v1455_v11  ;;  %864 = vmatpush.msra.mxu1 %v1702_v40 }
 0x3b2   :  { %752 = vmatpush.bf16.msrb.mxu2 %v1438_v13 }
 0x3b3   :  { %865 = vmatpush.msra.mxu1 %v1715_v47 }
 0x3b5   :  { %866 = vmatpush.msra.mxu1 %v1722_v48 }
 0x3b6   :  { %753 = vmatpush.bf16.msrb.mxu2 %v1437_v41 }
 0x3b7   :  { %867 = vmatpush.msra.mxu1 %v1728_v49 }
 0x3b8   :  { %1282 = vmatmul.msk.f32.gmra.mxu0 %vm77_vm0, %v1611_v15  ;;  %1286 = vmatmul.msk.f32.gmra.mxu1 %vm77_vm0, %v1616_v16  ;;  %v1454_v15 = vld [vmem:[%s2072_s6 + $0x90] sm:$0xff] }
 0x3b9   :  { %868 = vmatpush.msra.mxu1 %v1734_v50  ;;  %838 = vmatpush.bf16.msrb.mxu0 %v1454_v15 }
 0x3bb   :  { %869 = vmatpush.msra.mxu1 %v1743_v51 }
 0x3bd   :  { %870 = vmatpush.msra.mxu1 %v1750_v52  ;;  %839 = vmatpush.bf16.msrb.mxu0 %v1453_v42 }
 0x3bf   :  { %871 = vmatpush.msra.mxu1 %v1757_v53 }
 0x3c1   :  { %917 = vmatpush.msrb.mxu1 %v1764_v20  ;;  %v1436_v20 = vld [vmem:[%s2072_s6] sm:$0xff]  ;;  %840 = vmatpush.bf16.msrb.mxu0 %v1452_v43 }
 0x3c2   :  { %754 = vmatpush.bf16.msrb.mxu2 %v1436_v20 }
 0x3c6   :  { %931 = vmatpush.msra.mxu2 %v1648_v26 }
 0x3c8   :  { %932 = vmatpush.msra.mxu2 %v1653_v27 }
 0x3ca   :  { %933 = vmatpush.msra.mxu2 %v1660_v28 }
 0x3cc   :  { %934 = vmatpush.msra.mxu2 %v1667_v29 }
 0x3ce   :  { %935 = vmatpush.msra.mxu2 %v1674_v32 }
 0x3d0   :  { %936 = vmatpush.msra.mxu2 %v1681_v33 }
 0x3d2   :  { %937 = vmatpush.msra.mxu2 %v1688_v34 }
 0x3d4   :  { %938 = vmatpush.msra.mxu2 %v1695_v35 }
 0x3d6   :  { %939 = vmatpush.msra.mxu2 %v1702_v40 }
 0x3d8   :  { %940 = vmatpush.msra.mxu2 %v1715_v47 }
 0x3da   :  { %941 = vmatpush.msra.mxu2 %v1722_v48 }
 0x3dc   :  { %942 = vmatpush.msra.mxu2 %v1728_v49 }
 0x3de   :  { %943 = vmatpush.msra.mxu2 %v1734_v50 }
 0x3e0   :  { %944 = vmatpush.msra.mxu2 %v1743_v51 }
 0x3e2   :  { %945 = vmatpush.msra.mxu2 %v1750_v52 }
 0x3e4   :  { %946 = vmatpush.msra.mxu2 %v1757_v53 }
 0x41d   :  { %v554_v26 = vpop.f32.mrf.mxu0  ;;  %v583_v27 = vpop.f32.mrf.mxu1 }
 0x41f   :  { %v689_v50 = vpop.f32.mrf.mxu3 }
 0x425   :  { %v557_v28 = vpop.f32.mrf.mxu0  ;;  %v586_v29 = vpop.f32.mrf.mxu1 }
 0x426   :  { %v595_v32 = vpack.c.bf16 %v557_v28, %v554_v26  ;;  %v766_v33 = vpack.c.bf16 %v586_v29, %v583_v27 }
 0x427   :  { %v691_v46 = vpop.f32.mrf.mxu3 }
 0x428   :  { %755 = vmatmul.bf16.vlgmr.msrb.gmra.mxu2 %v595_v32  ;;  %841 = vmatmul.bf16.vlgmr.msrb.gmra.mxu0 %v766_v33 }
 0x42d   :  { %v560_v34 = vpop.f32.mrf.mxu0  ;;  %v589_v35 = vpop.f32.mrf.mxu1 }
 0x42f   :  { %v694_v61 = vpop.f32.mrf.mxu3 }
 0x435   :  { %v563_v40 = vpop.f32.mrf.mxu0  ;;  %v592_v47 = vpop.f32.mrf.mxu1 }
 0x436   :  { %v596_v48 = vpack.c.bf16 %v563_v40, %v560_v34  ;;  %v767_v49 = vpack.c.bf16 %v592_v47, %v589_v35 }
 0x437   :  { %v696_v2 = vpop.f32.mrf.mxu3 }
 0x438   :  { %760 = vmatmul.bf16.gmra.mxu2 %v596_v48  ;;  %846 = vmatmul.bf16.gmra.mxu0 %v767_v49 }
 0x4a5   :  { %v842_v51 = vpop.f32.mrf.mxu0 }
 0x4ab   :  { %v756_v44 = vpop.f32.mrf.mxu2 }
 0x4ac   :  { %v757_v52 = vadd.f32 %v756_v44, %v689_v50 }
 0x4ad   :  { %v844_v53 = vpop.f32.mrf.mxu0 }
 0x4ae   :  { %v852_v45 = vadd.f32 %v842_v51, %v757_v52 }
 0x4b0   :  { %872 = vmatmul.f32.vlgmr.msra.gmra.mxu1 %v852_v45 }
 0x4b3   :  { %v758_v54 = vpop.f32.mrf.mxu2 }
 0x4b4   :  { %v759_v56 = vadd.f32 %v758_v54, %v691_v46 }
 0x4b5   :  { %v847_v58 = vpop.f32.mrf.mxu0 }
 0x4b6   :  { %v853_v59 = vadd.f32 %v844_v53, %v759_v56 }
 0x4b8   :  { %875 = vmatmul.f32.gmra.mxu1 %v853_v59 }
 0x4bb   :  { %v761_v0 = vpop.f32.mrf.mxu2 }
 0x4bc   :  { %v762_v1 = vadd.f32 %v761_v0, %v694_v61  ;;  %v974_v0 = vld [vmem:[%s2075_s7] sm:$0x1] }
 0x4bd   :  { %v849_v7 = vpop.f32.mrf.mxu0 }
 0x4be   :  { %v854_v63 = vadd.f32 %v847_v58, %v762_v1 }
 0x4c0   :  { %878 = vmatmul.f32.gmra.mxu1 %v854_v63 }
 0x4c3   :  { %v763_v3 = vpop.f32.mrf.mxu2 }
 0x4c4   :  { %v764_v5 = vadd.f32 %v763_v3, %v696_v2  ;;  %v1010_v3 = vld [vmem:[%s2076_s8] sm:$0x1] }
 0x4c6   :  { %v855_v8 = vadd.f32 %v849_v7, %v764_v5 }
 0x4c8   :  { %881 = vmatmul.f32.gmra.mxu1 %v855_v8 }
 0x52d   :  { %v873_v9 = vpop.f32.mrf.mxu1 }
 0x52e   :  { %v885_v19 = vsel %vm373_vm2, %v873_v9, 0.0 }
 0x535   :  { %v876_v10 = vpop.f32.mrf.mxu1 }
 0x536   :  { %v886_v18 = vsel %vm373_vm2, %v876_v10, 0.0 }
 0x537   :  { %v887_v22 = vadd.f32 %v886_v18, %v885_v19 }
 0x53d   :  { %v879_v17 = vpop.f32.mrf.mxu1 }
 0x53e   :  { %v888_v21 = vsel %vm373_vm2, %v879_v17, 0.0 }
 0x53f   :  { %v889_v23 = vadd.f32 %v888_v21, %v887_v22 }
 0x545   :  { %v882_v24 = vpop.f32.mrf.mxu1 }
 0x546   :  { %v890_v25 = vsel %vm373_vm2, %v882_v24, 0.0 }
 0x547   :  { %v891_v55 = vadd.f32 %v890_v25, %v889_v23 }
 0x549   :  { %v892_v57 = vrot.slane %v891_v55, 4 }
 0x54b   :  { %v893_v60 = vadd.f32 %v892_v57, %v891_v55 }
 0x54d   :  { %v894_v62 = vrot.slane %v893_v60, 2 }
 0x54f   :  { %v895_v30 = vadd.f32 %v894_v62, %v893_v60 }
 0x551   :  { %v896_v31 = vrot.slane %v895_v30, 1 }
 0x553   :  { %v897_v36 = vadd.f32 %v896_v31, %v895_v30  ;;  %v1127_v31 = vld [vmem:[%s2077_s12 + $0x78] sm:$0xff] }
 0x554   :  { %1128 = vmatpush.msrb.mxu2 %v1127_v31 }
 0x555   :  { %v898_v4 = vmul.f32 0.001953125, %v897_v36  ;;  %v1126_v36 = vld [vmem:[%s2077_s12 + $0x70] sm:$0xff] }
 0x556   :  { %1129 = vmatpush.msrb.mxu2 %v1126_v36 }
 0x557   :  { %1415 = vmatmul.msk.f32.vlgmr.msrb.gmra.mxu1 %vm373_vm2, %v898_v4  ;;  %v1122_v4 = vld [vmem:[%s2077_s12 + $0x50] sm:$0xff] }
 0x5d4   :  { %v919_v37 = vpop.f32.mrf.mxu1 }
 0x5d5   :  { %v922_v38 = vperm.slane %v919_v37, 0  ;;  %v1121_v37 = vld [vmem:[%s2077_s12 + $0x48] sm:$0xff] }
 0x5d7   :  { %v923_v39 = vsub.f32 %v852_v45, %v922_v38  ;;  %v924_v13 = vsub.f32 %v853_v59, %v922_v38  ;;  %v925_v41 = vsub.f32 %v854_v63, %v922_v38  ;;  %v926_v20 = vsub.f32 %v855_v8, %v922_v38  ;;  %v1120_v38 = vld [vmem:[%s2077_s12 + $0x40] sm:$0xff] }
 0x5d9   :  { %v927_v11 = vmul.f32 %v923_v39, %v923_v39  ;;  %v928_v15 = vmul.f32 %v924_v13, %v924_v13  ;;  %v929_v42 = vmul.f32 %v925_v41, %v925_v41  ;;  %v930_v43 = vmul.f32 %v926_v20, %v926_v20 }
 0x5db   :  { %947 = vmatmul.f32.vlgmr.msra.gmra.mxu2 %v927_v11  ;;  %v1119_v11 = vld [vmem:[%s2077_s12 + $0x38] sm:$0xff] }
 0x5e3   :  { %950 = vmatmul.f32.gmra.mxu2 %v928_v15  ;;  %v1118_v15 = vld [vmem:[%s2077_s12 + $0x30] sm:$0xff] }
 0x5eb   :  { %953 = vmatmul.f32.gmra.mxu2 %v929_v42  ;;  %v1117_v42 = vld [vmem:[%s2077_s12 + $0x28] sm:$0xff] }
 0x5f3   :  { %956 = vmatmul.f32.gmra.mxu2 %v930_v43  ;;  %v1116_v43 = vld [vmem:[%s2077_s12 + $0x20] sm:$0xff] }
 0x65e   :  { %v948_v26 = vpop.f32.mrf.mxu2 }
 0x65f   :  { %v960_v32 = vsel %vm373_vm2, %v948_v26, 0.0 }
 0x666   :  { %v951_v27 = vpop.f32.mrf.mxu2 }
 0x667   :  { %v961_v29 = vsel %vm373_vm2, %v951_v27, 0.0  ;;  %v1081_v27 = vld [vmem:[%s2078_s11] sm:$0xff] }
 0x668   :  { %v962_v34 = vadd.f32 %v961_v29, %v960_v32  ;;  %v1114_v29 = vld [vmem:[%s2077_s12 + $0x10] sm:$0xff]  ;;  %v1113_v32 = vld [vmem:[%s2077_s12 + $0x8] sm:$0xff] }
 0x66e   :  { %v954_v28 = vpop.f32.mrf.mxu2 }
 0x66f   :  { %v963_v33 = vsel %vm373_vm2, %v954_v28, 0.0  ;;  %v1115_v28 = vld [vmem:[%s2077_s12 + $0x18] sm:$0xff] }
 0x670   :  { %v964_v35 = vadd.f32 %v963_v33, %v962_v34  ;;  %v1082_v33 = vld [vmem:[%s2078_s11 + $0x8] sm:$0xff]  ;;  %v1112_v34 = vld [vmem:[%s2077_s12] sm:$0xff] }
 0x676   :  { %v957_v40 = vpop.f32.mrf.mxu2 }
 0x677   :  { %v965_v47 = vsel %vm373_vm2, %v957_v40, 0.0  ;;  %v1167_v40 = vld [vmem:[%s2079_s13 + $0x70] sm:$0xff] }
 0x678   :  { %v966_v48 = vadd.f32 %v965_v47, %v964_v35  ;;  %v1168_v35 = vld [vmem:[%s2079_s13 + $0x78] sm:$0xff]  ;;  %v1166_v47 = vld [vmem:[%s2079_s13 + $0x68] sm:$0xff] }
 0x67a   :  { %v967_v49 = vrot.slane %v966_v48, 4 }
 0x67c   :  { %v968_v50 = vadd.f32 %v967_v49, %v966_v48  ;;  %v1165_v48 = vld [vmem:[%s2079_s13 + $0x60] sm:$0xff]  ;;  %v1164_v49 = vld [vmem:[%s2079_s13 + $0x58] sm:$0xff] }
 0x67e   :  { %v969_v51 = vrot.slane %v968_v50, 2 }
 0x680   :  { %v970_v44 = vadd.f32 %v969_v51, %v968_v50  ;;  %v1163_v50 = vld [vmem:[%s2079_s13 + $0x50] sm:$0xff]  ;;  %v1162_v51 = vld [vmem:[%s2079_s13 + $0x48] sm:$0xff] }
 0x682   :  { %v971_v52 = vrot.slane %v970_v44, 1 }
 0x684   :  { %v972_v45 = vadd.f32 %v971_v52, %v970_v44  ;;  %v1161_v44 = vld [vmem:[%s2079_s13 + $0x40] sm:$0xff]  ;;  %v1160_v52 = vld [vmem:[%s2079_s13 + $0x38] sm:$0xff] }
 0x686   :  { %v973_v46 = vmul.f32 0.001953125, %v972_v45  ;;  %v1159_v45 = vld [vmem:[%s2079_s13 + $0x30] sm:$0xff] }
 0x688   :  { %v975_v53 = vadd.f32 1e-05, %v973_v46  ;;  %v1158_v46 = vld [vmem:[%s2079_s13 + $0x28] sm:$0xff] }
 0x68a   :  { %1462 = vrsqrt.f32 %v975_v53  ;;  %vm982_vm7 = vweird.f32 %v975_v53 }
 0x690   :  { %v1463_v54 = vpop.eup %1462 }
 0x691   :  { %v977_v56 = vmul.f32 %v1463_v54, %v975_v53  ;;  %vm983_vm6 = vweird.f32 %v1463_v54  ;;  %v1157_v53 = vld [vmem:[%s2079_s13 + $0x20] sm:$0xff] }
 0x692   :  { %vm984_vm8 = vmor %vm982_vm7, %vm983_vm6 }
 0x693   :  { %v978_v59 = vmul.f32 %v1463_v54, %v977_v56 }
 0x695   :  { %v979_v61 = vmul.f32 0.5, %v978_v59  ;;  %v1155_v59 = vld [vmem:[%s2079_s13 + $0x10] sm:$0xff] }
 0x697   :  { %v980_v58 = vsub.f32 1.5, %v979_v61 }
 0x699   :  { %v981_v1 = vmul.f32 %v1463_v54, %v980_v58  ;;  %v1154_v58 = vld [vmem:[%s2079_s13 + $0x8] sm:$0xff] }
 0x69b   :  { %v985_v63 = vsel %vm984_vm8, %v1463_v54, %v981_v1  ;;  %v1156_v54 = vld [vmem:[%s2079_s13 + $0x18] sm:$0xff] }
 0x69c   :  { %v986_v2 = vmul.f32 %v985_v63, %v974_v0  ;;  %v1153_v0 = vld [vmem:[%s2079_s13] sm:$0xff] }
 0x69e   :  { %1416 = vmatmul.msk.f32.vlgmr.msrb.gmra.mxu3 %vm373_vm2, %v986_v2 }
 0x69f   :  { %1169 = vmatpush.msrb.mxu3 %v1168_v35 }
 0x6a1   :  { %1170 = vmatpush.msrb.mxu3 %v1167_v40 }
 0x6a3   :  { %1171 = vmatpush.msrb.mxu3 %v1166_v47 }
 0x6a5   :  { %1172 = vmatpush.msrb.mxu3 %v1165_v48 }
 0x6a6   :  { %1417 = vmatmul.msk.f32.vlgmr.msra.gmra.mxu3 %vm373_vm2, %v1010_v3 }
 0x6a7   :  { %1173 = vmatpush.msrb.mxu3 %v1164_v49 }
 0x6a9   :  { %1174 = vmatpush.msrb.mxu3 %v1163_v50 }
 0x6ab   :  { %1175 = vmatpush.msrb.mxu3 %v1162_v51 }
 0x6ad   :  { %1176 = vmatpush.msrb.mxu3 %v1161_v44 }
 0x6af   :  { %1177 = vmatpush.msrb.mxu3 %v1160_v52 }
 0x6b1   :  { %1178 = vmatpush.msrb.mxu3 %v1159_v45 }
 0x6b3   :  { %1179 = vmatpush.msrb.mxu3 %v1158_v46 }
 0x6b5   :  { %1180 = vmatpush.msrb.mxu3 %v1157_v53 }
 0x6b7   :  { %1181 = vmatpush.msrb.mxu3 %v1156_v54 }
 0x6b9   :  { %1182 = vmatpush.msrb.mxu3 %v1155_v59 }
 0x6bb   :  { %1183 = vmatpush.msrb.mxu3 %v1154_v58 }
 0x6bd   :  { %1184 = vmatpush.msrb.mxu3 %v1153_v0 }
 0x721   :  { %v1007_v5 = vpop.f32.mrf.mxu3 }
 0x722   :  { %v1034_v7 = vperm.slane %v1007_v5, 0 }
 0x724   :  { %v1038_v9 = vmul.f32 %v1034_v7, %v926_v20  ;;  %v1037_v17 = vmul.f32 %v1034_v7, %v925_v41  ;;  %v1036_v21 = vmul.f32 %v1034_v7, %v924_v13  ;;  %v1035_v24 = vmul.f32 %v1034_v7, %v923_v39 }
 0x729   :  { %v1031_v8 = vpop.f32.mrf.mxu3 }
 0x72a   :  { %v1039_v10 = vperm.slane %v1031_v8, 0 }
 0x72c   :  { %v1043_v18 = vadd.f32 %v1039_v10, %v1038_v9  ;;  %v1042_v19 = vadd.f32 %v1039_v10, %v1037_v17  ;;  %v1041_v23 = vadd.f32 %v1039_v10, %v1036_v21  ;;  %v1040_v55 = vadd.f32 %v1039_v10, %v1035_v24 }
 0x72e   :  { %v1047_v22 = vmax.f32 %v1043_v18, 0.0  ;;  %v1046_v25 = vmax.f32 %v1042_v19, 0.0  ;;  %v1045_v57 = vmax.f32 %v1041_v23, 0.0  ;;  %v1044_v60 = vmax.f32 %v1040_v55, 0.0 }
 0x730   :  { %1060 = vmatpush.msra.mxu0 %v1047_v22 }
 0x732   :  { %1061 = vmatpush.msra.mxu0 %v1046_v25 }
 0x734   :  { %1062 = vmatpush.msra.mxu0 %v1045_v57 }
 0x736   :  { %1063 = vmatpush.msra.mxu0 %v1044_v60 }
 0x737   :  { %1418 = vmatmul.msk.f32.vlgmr.msra.gmra.mxu0 %vm77_vm0, %v1562_v6  ;;  %v1125_v6 = vld [vmem:[%s2077_s12 + $0x68] sm:$0xff] }
 0x738   :  { %1130 = vmatpush.msrb.mxu2 %v1125_v6 }
 0x73f   :  { %1419 = vmatmul.msk.f32.gmra.mxu0 %vm77_vm0, %v1588_v12  ;;  %v1124_v12 = vld [vmem:[%s2077_s12 + $0x60] sm:$0xff] }
 0x740   :  { %1131 = vmatpush.msrb.mxu2 %v1124_v12 }
 0x747   :  { %1420 = vmatmul.msk.f32.gmra.mxu0 %vm77_vm0, %v1602_v14 }
 0x74f   :  { %1421 = vmatmul.msk.f32.gmra.mxu0 %vm77_vm0, %v1616_v16  ;;  %v1123_v16 = vld [vmem:[%s2077_s12 + $0x58] sm:$0xff] }
 0x750   :  { %1132 = vmatpush.msrb.mxu2 %v1123_v16 }
 0x752   :  { %1133 = vmatpush.msrb.mxu2 %v1122_v4 }
 0x754   :  { %1134 = vmatpush.msrb.mxu2 %v1121_v37 }
 0x756   :  { %1135 = vmatpush.msrb.mxu2 %v1120_v38 }
 0x758   :  { %1136 = vmatpush.msrb.mxu2 %v1119_v11 }
 0x75a   :  { %1137 = vmatpush.msrb.mxu2 %v1118_v15 }
 0x75c   :  { %1138 = vmatpush.msrb.mxu2 %v1117_v42 }
 0x75e   :  { %1139 = vmatpush.msrb.mxu2 %v1116_v43 }
 0x760   :  { %1140 = vmatpush.msrb.mxu2 %v1115_v28 }
 0x762   :  { %1141 = vmatpush.msrb.mxu2 %v1114_v29 }
 0x764   :  { %1142 = vmatpush.msrb.mxu2 %v1113_v32 }
 0x766   :  { %1143 = vmatpush.msrb.mxu2 %v1112_v34 }
 0x7b4   :  { %v1065_v62 = vpop.f32.mrf.mxu0 }
 0x7b5   :  { %v1077_v26 = vmax.f32 %v1044_v60, %v1065_v62 }
 0x7bc   :  { %v1068_v30 = vpop.f32.mrf.mxu0 }
 0x7bd   :  { %v1078_v20 = vmax.f32 %v1045_v57, %v1068_v30 }
 0x7c4   :  { %v1071_v14 = vpop.f32.mrf.mxu0 }
 0x7c5   :  { %v1079_v41 = vmax.f32 %v1046_v25, %v1071_v14 }
 0x7cc   :  { %v1074_v39 = vpop.f32.mrf.mxu0 }
 0x7cd   :  { %v1080_v13 = vmax.f32 %v1047_v22, %v1074_v39 }
 0x7cf   :  { %1101 = vmatpush.msra.mxu1 %v1080_v13 }
 0x7d1   :  { %1102 = vmatpush.msra.mxu1 %v1079_v41 }
 0x7d3   :  { %1103 = vmatpush.msra.mxu1 %v1078_v20 }
 0x7d5   :  { %1104 = vmatpush.msra.mxu1 %v1077_v26 }
 0x7d6   :  { %1422 = vmatmul.msk.f32.vlgmr.msra.gmra.mxu1 %vm77_vm0, %v1081_v27 }
 0x7de   :  { %1423 = vmatmul.msk.f32.gmra.mxu1 %vm77_vm0, %v1082_v33 }
 0x853   :  { %v1106_v56 = vpop.f32.mrf.mxu1 }
 0x854   :  { %1144 = vmatmul.f32.vlgmr.msrb.gmra.mxu2 %v1106_v56 }
 0x85b   :  { %v1109_v61 = vpop.f32.mrf.mxu1 }
 0x85c   :  { %1147 = vmatmul.f32.gmra.mxu2 %v1109_v61 }
 0x8d7   :  { %v1145_v1 = vpop.f32.mrf.mxu2 }
 0x8d8   :  { %v1151_v63 = vmax.f32 %v1106_v56, %v1145_v1 }
 0x8da   :  { %1185 = vmatmul.f32.vlgmr.msrb.gmra.mxu3 %v1151_v63 }
 0x8df   :  { %v1148_v2 = vpop.f32.mrf.mxu2 }
 0x8e0   :  { %v1152_v3 = vmax.f32 %v1109_v61, %v1148_v2 }
 0x8e2   :  { %1188 = vmatmul.f32.gmra.mxu3 %v1152_v3 }
 0x95d   :  { %v1186_v5 = vpop.f32.mrf.mxu3 }
 0x95e   :  { %1192 = vst.msk [vmem:[%s2080_s14] sm:$0xff] %vm205_vm1, %v1186_v5 }
 0x965   :  { %v1189_v7 = vpop.f32.mrf.mxu3 }
 0x966   :  { %1193 = vst.msk [vmem:[%s2080_s14 + $0x8] sm:$0xff] %vm205_vm1, %v1189_v7 }

</bundles_post_ra>
